<compile_context>
chip_gen: v7x
topology: tpu7x:2x2x1
jax: 0.10.0
libtpu: 0.0.40
codegen_flags: <defaults>
</compile_context>

<pallas_src>
import functools

import jax
import jax.numpy as jnp
from jax.experimental import pallas as pl
from jax.experimental.pallas import tpu as pltpu


def _round_up(x, m):
    return (x + m - 1) // m * m


# ---------------------------------------------------------------------------
# Kernel: fused MLP (all layers in one body, all params VMEM-resident).
# refs = (x_ref, w0, b0, w1, b1, ..., w_{L-1}, b_{L-1}, o_ref)
# ---------------------------------------------------------------------------
def _fused_mlp_kernel(*refs, relu_flags):
    n_layers = len(relu_flags)
    x_ref = refs[0]
    o_ref = refs[1 + 2 * n_layers]

    h = x_ref[...]
    for i, apply_relu in enumerate(relu_flags):
        w = refs[1 + 2 * i][...]
        b = refs[2 + 2 * i][...]
        h = jnp.dot(h, w, preferred_element_type=jnp.float32) + b
        if apply_relu:
            h = jnp.maximum(h, 0.0)
    o_ref[...] = h.astype(o_ref.dtype)


# ---------------------------------------------------------------------------
# Wrapper: single pallas_call over an M (batch) grid; params fully resident.
# ---------------------------------------------------------------------------
@functools.partial(jax.jit, static_argnames=("relu_flags", "out_dim", "tm_cap"))
def fused_mlp_forward(x, weights, biases, *, relu_flags, out_dim, tm_cap=256):
    """x: (M, K) f32. weights[i]: (Kp_i, Np_i) pre-padded; biases[i]: (1, Np_i).

    Returns (M, out_dim) = the unpadded MLP output.
    """
    M, K = x.shape
    K0p = weights[0].shape[0]
    Np_last = weights[-1].shape[1]
    assert K <= K0p

    # Batch tiling: one block if the (8-rounded) batch fits tm_cap, else 256-row tiles.
    Mp = _round_up(M, 8)
    TM = Mp if Mp <= tm_cap else tm_cap
    Mp = _round_up(M, TM)

    if (Mp, K0p) != (M, K):
        x_p = jnp.zeros((Mp, K0p), x.dtype).at[:M, :K].set(x)
    else:
        x_p = x  # already aligned: no wrapper-side copy.

    in_specs = [pl.BlockSpec((TM, K0p), lambda m: (m, 0))]
    operands = [x_p]
    for w, b in zip(weights, biases):
        in_specs.append(pl.BlockSpec(w.shape, lambda m: (0, 0)))  # resident weight
        in_specs.append(pl.BlockSpec(b.shape, lambda m: (0, 0)))  # resident bias
        operands.append(w)
        operands.append(b)

    out_p = pl.pallas_call(
        functools.partial(_fused_mlp_kernel, relu_flags=tuple(relu_flags)),
        out_shape=jax.ShapeDtypeStruct((Mp, Np_last), x.dtype),
        grid_spec=pltpu.PrefetchScalarGridSpec(
            num_scalar_prefetch=0,
            grid=(Mp // TM,),
            in_specs=in_specs,
            out_specs=pl.BlockSpec((TM, Np_last), lambda m: (m, 0)),
        ),
        compiler_params=pltpu.CompilerParams(
            dimension_semantics=("parallel",),  # batch rows are independent
        ),
    )(*operands)

    return out_p[:M, :out_dim]


# ---------------------------------------------------------------------------
# Parameter construction (raw) + one-time padding to TPU-friendly shapes.
# ---------------------------------------------------------------------------
def init_params(key, layer_dims):
    """nn.Linear-style uniform(-1/sqrt(in), 1/sqrt(in)) init, weights as (in, out)."""
    params = []
    for in_dim, out_dim in zip(layer_dims[:-1], layer_dims[1:]):
        key, kw, kb = jax.random.split(key, 3)
        bound = 1.0 / jnp.sqrt(in_dim)
        w = jax.random.uniform(kw, (in_dim, out_dim), jnp.float32, -bound, bound)
        b = jax.random.uniform(kb, (out_dim,), jnp.float32, -bound, bound)
        params.append((w, b))
    return params


def pad_params(params, layer_dims):
    """Zero-pad every feature dim up to a multiple of 128 — done ONCE, not per call.

    Zero-padded output columns stay zero through bias-add/ReLU, and the matching
    zero-padded input rows of the next weight contribute nothing, so numerics are exact.
    """
    pdims = [_round_up(d, 128) for d in layer_dims]
    weights, biases = [], []
    for i, (w, b) in enumerate(params):
        in_dim, out_dim = w.shape
        w_p = jnp.zeros((pdims[i], pdims[i + 1]), jnp.float32).at[:in_dim, :out_dim].set(w)
        b_p = jnp.zeros((1, pdims[i + 1]), jnp.float32).at[0, :out_dim].set(b)
        weights.append(w_p)
        biases.append(b_p)
    return tuple(weights), tuple(biases)


def reference_forward(x, params, relu_flags):
    for (w, b), relu in zip(params, relu_flags):
        x = x @ w + b
        if relu:
            x = jnp.maximum(x, 0.0)
    return x


if __name__ == "__main__":
    # Small-shape instantiation of MyCustomModel:
    #   resolution=16  -> input features = 256
    #   intermidiate_dimensions=[128, 64]
    #   n_classes=32
    n_classes = 32
    resolution = 16
    intermidiate_dimensions = [128, 64]
    layer_dims = [resolution * resolution] + intermidiate_dimensions + [n_classes]

    # Explicit per-layer ReLU flags (exactly the module's construction rule).
    relu_flags = tuple(out_dim != n_classes for out_dim in layer_dims[1:])

    batch = 8
    key = jax.random.PRNGKey(0)
    key, kx = jax.random.split(key)
    x = jax.random.normal(kx, (batch, resolution * resolution), jnp.float32)

    params = init_params(key, layer_dims)
    weights_p, biases_p = pad_params(params, layer_dims)  # padded once, reused every call

    out = fused_mlp_forward(
        x, weights_p, biases_p, relu_flags=relu_flags, out_dim=n_classes
    )
    out = jax.block_until_ready(out)

    ref = reference_forward(x, params, relu_flags)
    assert out.shape == (batch, n_classes)
    assert jnp.allclose(out, ref, atol=1e-4, rtol=1e-4)

    print("KERNEL_OK")
</pallas_src>

<mosaic_0001>
module attributes {stable_mosaic.version = 11 : i64} {
  func.func @_fused_mlp_kernel(%arg0: i32, %arg1: memref<8x256xf32, #tpu.memory_space<vmem>>, %arg2: memref<256x128xf32, #tpu.memory_space<vmem>>, %arg3: memref<1x128xf32, #tpu.memory_space<vmem>>, %arg4: memref<128x128xf32, #tpu.memory_space<vmem>>, %arg5: memref<1x128xf32, #tpu.memory_space<vmem>>, %arg6: memref<128x128xf32, #tpu.memory_space<vmem>>, %arg7: memref<1x128xf32, #tpu.memory_space<vmem>>, %arg8: memref<8x128xf32, #tpu.memory_space<vmem>>) attributes {dimension_semantics = [#tpu.dimension_semantics<parallel>], iteration_bounds = array<i64: 1>, scalar_prefetch = 0 : i64, scratch_operands = 0 : i64, tpu.core_type = #tpu.core_type<tc>, window_params = [{transform_indices = @transform_0, window_bounds = array<i64: 8, 256>}, {pipeline_mode = #tpu.pipeline_mode<synchronous>, transform_indices = @transform_1, window_bounds = array<i64: 256, 128>}, {pipeline_mode = #tpu.pipeline_mode<synchronous>, transform_indices = @transform_2, window_bounds = array<i64: 1, 128>}, {pipeline_mode = #tpu.pipeline_mode<synchronous>, transform_indices = @transform_3, window_bounds = array<i64: 128, 128>}, {pipeline_mode = #tpu.pipeline_mode<synchronous>, transform_indices = @transform_4, window_bounds = array<i64: 1, 128>}, {pipeline_mode = #tpu.pipeline_mode<synchronous>, transform_indices = @transform_5, window_bounds = array<i64: 128, 128>}, {pipeline_mode = #tpu.pipeline_mode<synchronous>, transform_indices = @transform_6, window_bounds = array<i64: 1, 128>}, {transform_indices = @transform_7, window_bounds = array<i64: 8, 128>}]} {
    %c0 = arith.constant 0 : index
    %c0_0 = arith.constant 0 : index
    %0 = vector.load %arg1[%c0, %c0_0] : memref<8x256xf32, #tpu.memory_space<vmem>>, vector<8x256xf32>
    %c0_1 = arith.constant 0 : index
    %c0_2 = arith.constant 0 : index
    %1 = vector.load %arg2[%c0_1, %c0_2] : memref<256x128xf32, #tpu.memory_space<vmem>>, vector<256x128xf32>
    %c0_3 = arith.constant 0 : index
    %c0_4 = arith.constant 0 : index
    %2 = vector.load %arg3[%c0_3, %c0_4] : memref<1x128xf32, #tpu.memory_space<vmem>>, vector<1x128xf32>
    %cst = arith.constant dense<0.000000e+00> : vector<8x128xf32>
    %3 = tpu.matmul %0, %1, %cst {dimension_numbers = #tpu.dot_dimension_numbers<[1], [0], [0], [1], [0, 0, 1, 1], [], []>} : vector<8x256xf32>, vector<256x128xf32>, vector<8x128xf32> -> vector<8x128xf32>
    %4 = vector.broadcast %2 : vector<1x128xf32> to vector<8x128xf32>
    %5 = arith.addf %3, %4 : vector<8x128xf32>
    %cst_5 = arith.constant 0.000000e+00 : f32
    %6 = vector.broadcast %cst_5 : f32 to vector<8x128xf32>
    %7 = arith.maximumf %5, %6 : vector<8x128xf32>
    %c0_6 = arith.constant 0 : index
    %c0_7 = arith.constant 0 : index
    %8 = vector.load %arg4[%c0_6, %c0_7] : memref<128x128xf32, #tpu.memory_space<vmem>>, vector<128x128xf32>
    %c0_8 = arith.constant 0 : index
    %c0_9 = arith.constant 0 : index
    %9 = vector.load %arg5[%c0_8, %c0_9] : memref<1x128xf32, #tpu.memory_space<vmem>>, vector<1x128xf32>
    %cst_10 = arith.constant dense<0.000000e+00> : vector<8x128xf32>
    %10 = tpu.matmul %7, %8, %cst_10 {dimension_numbers = #tpu.dot_dimension_numbers<[1], [0], [0], [1], [0, 0, 1, 1], [], []>} : vector<8x128xf32>, vector<128x128xf32>, vector<8x128xf32> -> vector<8x128xf32>
    %11 = vector.broadcast %9 : vector<1x128xf32> to vector<8x128xf32>
    %12 = arith.addf %10, %11 : vector<8x128xf32>
    %cst_11 = arith.constant 0.000000e+00 : f32
    %13 = vector.broadcast %cst_11 : f32 to vector<8x128xf32>
    %14 = arith.maximumf %12, %13 : vector<8x128xf32>
    %c0_12 = arith.constant 0 : index
    %c0_13 = arith.constant 0 : index
    %15 = vector.load %arg6[%c0_12, %c0_13] : memref<128x128xf32, #tpu.memory_space<vmem>>, vector<128x128xf32>
    %c0_14 = arith.constant 0 : index
    %c0_15 = arith.constant 0 : index
    %16 = vector.load %arg7[%c0_14, %c0_15] : memref<1x128xf32, #tpu.memory_space<vmem>>, vector<1x128xf32>
    %cst_16 = arith.constant dense<0.000000e+00> : vector<8x128xf32>
    %17 = tpu.matmul %14, %15, %cst_16 {dimension_numbers = #tpu.dot_dimension_numbers<[1], [0], [0], [1], [0, 0, 1, 1], [], []>} : vector<8x128xf32>, vector<128x128xf32>, vector<8x128xf32> -> vector<8x128xf32>
    %18 = vector.broadcast %16 : vector<1x128xf32> to vector<8x128xf32>
    %19 = arith.addf %17, %18 : vector<8x128xf32>
    %c0_17 = arith.constant 0 : index
    %c0_18 = arith.constant 0 : index
    %20 = vector.load %arg8[%c0_17, %c0_18] : memref<8x128xf32, #tpu.memory_space<vmem>>, vector<8x128xf32>
    tpu.vector_store %arg8[%c0_17, %c0_18], %19 {strides = array<i32>} : memref<8x128xf32, #tpu.memory_space<vmem>>, vector<8x128xf32>,
    return
  }
  func.func @transform_0(%arg0: i32) -> (i32, i32) {
    %c0_i32 = arith.constant 0 : i32
    %c0_i32_0 = arith.constant 0 : i32
    return %arg0, %c0_i32 : i32, i32
  }
  func.func @transform_1(%arg0: i32) -> (i32, i32) {
    %c0_i32 = arith.constant 0 : i32
    %c0_i32_0 = arith.constant 0 : i32
    %c0_i32_1 = arith.constant 0 : i32
    return %c0_i32, %c0_i32_0 : i32, i32
  }
  func.func @transform_2(%arg0: i32) -> (i32, i32) {
    %c0_i32 = arith.constant 0 : i32
    %c0_i32_0 = arith.constant 0 : i32
    %c0_i32_1 = arith.constant 0 : i32
    return %c0_i32, %c0_i32_0 : i32, i32
  }
  func.func @transform_3(%arg0: i32) -> (i32, i32) {
    %c0_i32 = arith.constant 0 : i32
    %c0_i32_0 = arith.constant 0 : i32
    %c0_i32_1 = arith.constant 0 : i32
    return %c0_i32, %c0_i32_0 : i32, i32
  }
  func.func @transform_4(%arg0: i32) -> (i32, i32) {
    %c0_i32 = arith.constant 0 : i32
    %c0_i32_0 = arith.constant 0 : i32
    %c0_i32_1 = arith.constant 0 : i32
    return %c0_i32, %c0_i32_0 : i32, i32
  }
  func.func @transform_5(%arg0: i32) -> (i32, i32) {
    %c0_i32 = arith.constant 0 : i32
    %c0_i32_0 = arith.constant 0 : i32
    %c0_i32_1 = arith.constant 0 : i32
    return %c0_i32, %c0_i32_0 : i32, i32
  }
  func.func @transform_6(%arg0: i32) -> (i32, i32) {
    %c0_i32 = arith.constant 0 : i32
    %c0_i32_0 = arith.constant 0 : i32
    %c0_i32_1 = arith.constant 0 : i32
    return %c0_i32, %c0_i32_0 : i32, i32
  }
  func.func @transform_7(%arg0: i32) -> (i32, i32) {
    %c0_i32 = arith.constant 0 : i32
    %c0_i32_0 = arith.constant 0 : i32
    return %arg0, %c0_i32 : i32, i32
  }
}

</mosaic_0001>

<bundles_post_ra>
// kernel: fused_mlp_forward.1
= control target key start
LH: loop header
LB: loop body
LE: loop exit
PB: predicated region body
PF: predicated region fallthrough
CT: control target
= control target key end

     0   :  { %12 = vsyncpa [#allocation3], 0  ;;  %s891_s0 = inlined_call_operand.hbm [shape: f32[8,256], index: 0, kind: input, shape index: {}]   ;;  %s892_s1 = inlined_call_operand.hbm [shape: f32[256,128], index: 1, kind: input, shape index: {}]   ;;  %s893_s2 = inlined_call_operand.vmem [shape: f32[1,128], index: 2, kind: input, shape index: {}]   ;;  %s894_s3 = inlined_call_operand.hbm [shape: f32[128,128], index: 3, kind: input, shape index: {}]   ;;  %s895_s4 = inlined_call_operand.vmem [shape: f32[1,128], index: 4, kind: input, shape index: {}]   ;;  %s896_s5 = inlined_call_operand.hbm [shape: f32[128,128], index: 5, kind: input, shape index: {}]   ;;  %s897_s6 = inlined_call_operand.vmem [shape: f32[1,128], index: 6, kind: input, shape index: {}]   ;;  %s898_s7 = inlined_call_operand.hbm [shape: f32[8,128], index: 7, kind: output, shape index: {}]  }
   0x1   :  { %13 = vsyncpa [#allocation6], 0 }
   0x2   :  { %14 = vsyncpa [#allocation9], 0 }
   0x3   :  { %15 = vsyncpa [#allocation4], 0  ;;  %s747_s24 = smov [#allocation5]   ;;  %s629_s28 = scalar_lea.hbm %s892_s1, 4096 }
   0x4   :  { %s31_s25 = sshll.u32 %s747_s24, 4  ;;  %p630_p0 = scmp.ne.s32.totalorder %s892_s1, %s629_s28  ;;  %s32_s25 = int_to_ptr.vmem [resolvable:$true] %s31_s25 }
   0x5   :  { %p633_p1 = scmp.lt.u32.totalorder %s629_s28, %s892_s1 }
   0x7   :  { %p635_p2 = pnand %p633_p1, %p630_p0 }
   0x9   :  { %638 = shalt.err (!%p635_p2)
}
   0xa   :  { %s639_s10 = scalar_lea.vmem %s32_s25, 4096  ;;  %p644_p4 = scmp.lt.s32.totalorder %s32_s25, %s32_s25 }
   0xb   :  { %p640_p3 = scmp.ne.s32.totalorder %s32_s25, %s639_s10  ;;  %p645_p5 = scmp.lt.s32.totalorder %s639_s10, %s639_s10 }
   0xd   :  { %p646_p6 = por %p645_p5, %p644_p4 }
   0xf   :  { %p647_p7 = pnand %p646_p6, %p640_p3 }
  0x11   :  { %650 = shalt.err (!%p647_p7)
}
  0x12   :  { %s748_s11 = smov 128   ;;  %s749_s12 = smov 8  }
  0x13   :  { %37 = dma.hbm_to_vmem [thread:$0]  %s892_s1, 4096, %s32_s25, [#allocation6], %s748_s11, %s748_s11, %s749_s12  }
  0x14   :  { %s750_s15 = smov [#allocation2]   ;;  %s751_s17 = smov [#allocation7]  }
  0x15   :  { %s22_s16 = sshll.u32 %s750_s15, 4  ;;  %s45_s18 = sshll.u32 %s751_s17, 4  ;;  %s23_s16 = int_to_ptr.vmem [resolvable:$true] %s22_s16  ;;  %s46_s18 = int_to_ptr.vmem [resolvable:$true] %s45_s18 }
  0x16   :  { %s651_s21 = scalar_lea.hbm %s891_s0, 256 }
  0x17   :  { %p652_p8 = scmp.ne.s32.totalorder %s891_s0, %s651_s21  ;;  %p655_p9 = scmp.lt.u32.totalorder %s651_s21, %s891_s0 }
  0x19   :  { %p657_p10 = pnand %p655_p9, %p652_p8 }
  0x1b   :  { %660 = shalt.err (!%p657_p10)
}
  0x1c   :  { %s661_s1 = scalar_lea.vmem %s23_s16, 256  ;;  %p666_p12 = scmp.lt.s32.totalorder %s23_s16, %s23_s16 }
  0x1d   :  { %p662_p11 = scmp.ne.s32.totalorder %s23_s16, %s661_s1  ;;  %p667_p13 = scmp.lt.s32.totalorder %s661_s1, %s661_s1 }
  0x1f   :  { %p668_p0 = por %p667_p13, %p666_p12 }
  0x21   :  { %p669_p1 = pnand %p668_p0, %p662_p11 }
  0x23   :  { %672 = shalt.err (!%p669_p1)
}
  0x24   :  { %25 = dma.hbm_to_vmem [thread:$0]  %s891_s0, 256, %s23_s16, [#allocation3]  }
  0x25   :  { %s673_s30 = scalar_lea.hbm %s894_s3, 2048 }
  0x26   :  { %p674_p2 = scmp.ne.s32.totalorder %s894_s3, %s673_s30  ;;  %p677_p3 = scmp.lt.u32.totalorder %s673_s30, %s894_s3 }
  0x28   :  { %p679_p4 = pnand %p677_p3, %p674_p2 }
  0x2a   :  { %682 = shalt.err (!%p679_p4)
}
  0x2b   :  { %s683_s14 = scalar_lea.vmem %s46_s18, 2048  ;;  %p688_p6 = scmp.lt.s32.totalorder %s46_s18, %s46_s18 }
  0x2c   :  { %p684_p5 = scmp.ne.s32.totalorder %s46_s18, %s683_s14  ;;  %p689_p7 = scmp.lt.s32.totalorder %s683_s14, %s683_s14 }
  0x2e   :  { %p690_p8 = por %p689_p7, %p688_p6 }
  0x30   :  { %p691_p9 = pnand %p690_p8, %p684_p5 }
  0x32   :  { %694 = shalt.err (!%p691_p9)
}
  0x33   :  { %51 = dma.hbm_to_vmem [thread:$0]  %s894_s3, 2048, %s46_s18, [#allocation6], %s748_s11, %s748_s11, %s749_s12  }
  0x34   :  { %s752_s16 = smov [#allocation8]   ;;  %s695_s21 = scalar_lea.hbm %s896_s5, 2048 }
  0x35   :  { %s59_s17 = sshll.u32 %s752_s16, 4  ;;  %p696_p10 = scmp.ne.s32.totalorder %s896_s5, %s695_s21  ;;  %s60_s17 = int_to_ptr.vmem [resolvable:$true] %s59_s17 }
  0x36   :  { %p699_p11 = scmp.lt.u32.totalorder %s695_s21, %s896_s5 }
  0x38   :  { %p701_p12 = pnand %p699_p11, %p696_p10 }
  0x3a   :  { %704 = shalt.err (!%p701_p12)
}
  0x3b   :  { %s705_s1 = scalar_lea.vmem %s60_s17, 2048  ;;  %p710_p0 = scmp.lt.s32.totalorder %s60_s17, %s60_s17 }
  0x3c   :  { %p706_p13 = scmp.ne.s32.totalorder %s60_s17, %s705_s1  ;;  %p711_p1 = scmp.lt.s32.totalorder %s705_s1, %s705_s1 }
  0x3e   :  { %p712_p2 = por %p711_p1, %p710_p0 }
  0x40   :  { %p713_p3 = pnand %p712_p2, %p706_p13 }
  0x42   :  { %716 = shalt.err (!%p713_p3)
}
  0x43   :  { %65 = dma.hbm_to_vmem [thread:$0]  %s896_s5, 2048, %s60_s17, [#allocation9], %s748_s11, %s748_s11, %s749_s12  }
  0x44   :  { %739 = dma.done.wait [#allocation3], 256  }
  0x45   :  { %740 = vsyncadd [#allocation3], 4294967040 }
  0x46   :  { %741 = dma.done.wait [#allocation6], 6144  }
  0x47   :  { %742 = vsyncadd [#allocation6], 4294961152 }
  0x48   :  { %743 = dma.done.wait [#allocation9], 2048  }
  0x49   :  { %744 = vsyncadd [#allocation9], 4294965248  ;;  %v753_v0 = vmov 0.0|0.0   ;;  %v98_v1 = vld [vmem:[#allocation5 + $0x80] sm:$0xff]  ;;  %v99_v2 = vld [vmem:[#allocation5 + $0x88] sm:$0xff]  ;;  %vm754_vm0 = vmmov 0  }
  0x4a   :  { %571 = vmatprep.subr.bf16.mxu1 %v753_v0  ;;  %v82_v3 = vld [vmem:[#allocation5] sm:$0xff]  ;;  %v539_v4 = vpack.c.bf16 %v99_v2, %v98_v1  ;;  %v83_v5 = vld [vmem:[#allocation5 + $0x8] sm:$0xff]  ;;  %v100_v6 = vld [vmem:[#allocation5 + $0x90] sm:$0xff]  ;;  %s756_s28 = smov [#allocation10]  }
  0x4b   :  { %v101_v7 = vld [vmem:[#allocation5 + $0x98] sm:$0xff]  ;;  %v541_v8 = vpack.c.bf16 %v83_v5, %v82_v3  ;;  %v84_v10 = vld [vmem:[#allocation5 + $0x10] sm:$0xff]  ;;  %v102_v12 = vld [vmem:[#allocation5 + $0xa0] sm:$0xff]  ;;  %s386_s29 = sshll.u32 %s756_s28, 4  ;;  %s387_s29 = int_to_ptr.vmem [resolvable:$true] %s386_s29 }
  0x4c   :  { %v543_v9 = vpack.c.bf16 %v101_v7, %v100_v6  ;;  %v85_v11 = vld [vmem:[#allocation5 + $0x18] sm:$0xff]  ;;  %540 = vmatprep.subr.bf16.mxu0 %v539_v4  ;;  %v103_v13 = vld [vmem:[#allocation5 + $0xa8] sm:$0xff]  ;;  %v86_v16 = vld [vmem:[#allocation5 + $0x20] sm:$0xff]  ;;  %s717_s30 = scalar_lea.vmem %s387_s29, 128  ;;  %p722_p5 = scmp.lt.s32.totalorder %s387_s29, %s387_s29 }
  0x4d   :  { %542 = vmatpush3.bf16.msra.mxu0 %v541_v8  ;;  %v545_v14 = vpack.c.bf16 %v85_v11, %v84_v10  ;;  %v547_v15 = vpack.c.bf16 %v103_v13, %v102_v12  ;;  %v87_v17 = vld [vmem:[#allocation5 + $0x28] sm:$0xff]  ;;  %v104_v18 = vld [vmem:[#allocation5 + $0xb0] sm:$0xff]  ;;  %v105_v19 = vld [vmem:[#allocation5 + $0xb8] sm:$0xff]  ;;  %v755_v12 = vmov 0.0   ;;  %p718_p4 = scmp.ne.s32.totalorder %s387_s29, %s717_s30  ;;  %p723_p6 = scmp.lt.s32.totalorder %s717_s30, %s717_s30 }
  0x4e   :  { %544 = vmatprep.subr.bf16.mxu0 %v543_v9  ;;  %v549_v20 = vpack.c.bf16 %v87_v17, %v86_v16  ;;  %v551_v21 = vpack.c.bf16 %v105_v19, %v104_v18  ;;  %v88_v22 = vld [vmem:[#allocation5 + $0x30] sm:$0xff]  ;;  %v89_v23 = vld [vmem:[#allocation5 + $0x38] sm:$0xff]  ;;  %v106_v24 = vld [vmem:[#allocation5 + $0xc0] sm:$0xff]  ;;  %501 = vmatprep.mubr.msk.f32.mxu1 %vm754_vm0, %v755_v12 }
  0x4f   :  { %v107_v25 = vld [vmem:[#allocation5 + $0xc8] sm:$0xff]  ;;  %v81_v26 = vld [vmem:[#allocation2 + $0x8] sm:$0xff]  ;;  %v192_v27 = vld [vmem:[#allocation7] sm:$0xff]  ;;  %v553_v29 = vpack.c.bf16 %v89_v23, %v88_v22  ;;  %p724_p7 = por %p723_p6, %p722_p5 }
  0x50   :  { %185 = vmatprep.mubr.f32.mxu0 %v81_v26  ;;  %v193_v28 = vld [vmem:[#allocation7 + $0x8] sm:$0xff]  ;;  %v194_v31 = vld [vmem:[#allocation7 + $0x10] sm:$0xff]  ;;  %v195_v32 = vld [vmem:[#allocation7 + $0x18] sm:$0xff]  ;;  %v555_v33 = vpack.c.bf16 %v107_v25, %v106_v24 }
  0x51   :  { %546 = vmatpush3.bf16.msra.mxu0 %v545_v14  ;;  %v572_v30 = vpack.c.bf16 %v193_v28, %v192_v27  ;;  %v90_v34 = vld [vmem:[#allocation5 + $0x40] sm:$0xff]  ;;  %v91_v35 = vld [vmem:[#allocation5 + $0x48] sm:$0xff]  ;;  %v108_v36 = vld [vmem:[#allocation5 + $0xd0] sm:$0xff]  ;;  %v575_v38 = vpack.c.bf16 %v195_v32, %v194_v31  ;;  %p725_p8 = pnand %p724_p7, %p718_p4 }
  0x52   :  { %548 = vmatprep.subr.bf16.mxu0 %v547_v15  ;;  %v109_v37 = vld [vmem:[#allocation5 + $0xd8] sm:$0xff]  ;;  %v196_v39 = vld [vmem:[#allocation7 + $0x20] sm:$0xff]  ;;  %v197_v40 = vld [vmem:[#allocation7 + $0x28] sm:$0xff]  ;;  %v557_v41 = vpack.c.bf16 %v91_v35, %v90_v34 }
  0x53   :  { %573 = vmatpush3.bf16.msra.mxu1 %v572_v30  ;;  %v559_v42 = vpack.c.bf16 %v109_v37, %v108_v36  ;;  %v92_v43 = vld [vmem:[#allocation5 + $0x50] sm:$0xff]  ;;  %v93_v44 = vld [vmem:[#allocation5 + $0x58] sm:$0xff]  ;;  %v110_v45 = vld [vmem:[#allocation5 + $0xe0] sm:$0xff]  ;;  %v578_v47 = vpack.c.bf16 %v197_v40, %v196_v39 }
  0x54   :  { %574 = vmatprep.subr.bf16.mxu1 %v753_v0  ;;  %v111_v46 = vld [vmem:[#allocation5 + $0xe8] sm:$0xff]  ;;  %v198_v48 = vld [vmem:[#allocation7 + $0x30] sm:$0xff]  ;;  %v199_v49 = vld [vmem:[#allocation7 + $0x38] sm:$0xff]  ;;  %v561_v50 = vpack.c.bf16 %v93_v44, %v92_v43 }
  0x55   :  { %550 = vmatpush3.bf16.msra.mxu0 %v549_v20  ;;  %v563_v51 = vpack.c.bf16 %v111_v46, %v110_v45  ;;  %v94_v52 = vld [vmem:[#allocation5 + $0x60] sm:$0xff]  ;;  %v95_v53 = vld [vmem:[#allocation5 + $0x68] sm:$0xff]  ;;  %v112_v54 = vld [vmem:[#allocation5 + $0xf0] sm:$0xff]  ;;  %v581_v56 = vpack.c.bf16 %v199_v49, %v198_v48 }
  0x56   :  { %552 = vmatprep.subr.bf16.mxu0 %v551_v21  ;;  %v113_v55 = vld [vmem:[#allocation5 + $0xf8] sm:$0xff]  ;;  %v200_v57 = vld [vmem:[#allocation7 + $0x40] sm:$0xff]  ;;  %v201_v58 = vld [vmem:[#allocation7 + $0x48] sm:$0xff]  ;;  %v565_v59 = vpack.c.bf16 %v95_v53, %v94_v52 }
  0x57   :  { %576 = vmatpush3.bf16.msra.mxu1 %v575_v38  ;;  %v567_v60 = vpack.c.bf16 %v113_v55, %v112_v54  ;;  %v96_v61 = vld [vmem:[#allocation5 + $0x70] sm:$0xff]  ;;  %v97_v62 = vld [vmem:[#allocation5 + $0x78] sm:$0xff]  ;;  %v584_v63 = vpack.c.bf16 %v201_v58, %v200_v57  ;;  %v204_v6 = vld [vmem:[#allocation7 + $0x60] sm:$0xff] }
  0x58   :  { %577 = vmatprep.subr.bf16.mxu1 %v753_v0  ;;  %v202_v1 = vld [vmem:[#allocation7 + $0x50] sm:$0xff]  ;;  %v203_v2 = vld [vmem:[#allocation7 + $0x58] sm:$0xff]  ;;  %v569_v3 = vpack.c.bf16 %v97_v62, %v96_v61  ;;  %v205_v7 = vld [vmem:[#allocation7 + $0x68] sm:$0xff] }
  0x59   :  { %554 = vmatpush3.bf16.msra.mxu0 %v553_v29  ;;  %v587_v4 = vpack.c.bf16 %v203_v2, %v202_v1  ;;  %v80_v5 = vld [vmem:[#allocation2] sm:$0xff]  ;;  %v590_v8 = vpack.c.bf16 %v205_v7, %v204_v6  ;;  %v207_v10 = vld [vmem:[#allocation7 + $0x78] sm:$0xff]  ;;  %v286_v13 = vld [vmem:[#allocation8] sm:$0xff] }
  0x5a   :  { %556 = vmatprep.subr.bf16.mxu0 %v555_v33  ;;  %v206_v9 = vld [vmem:[#allocation7 + $0x70] sm:$0xff]  ;;  %v287_v14 = vld [vmem:[#allocation8 + $0x8] sm:$0xff]  ;;  %v289_v17 = vld [vmem:[#allocation8 + $0x18] sm:$0xff] }
  0x5b   :  { %579 = vmatpush3.bf16.msra.mxu1 %v578_v47  ;;  %v593_v11 = vpack.c.bf16 %v207_v10, %v206_v9  ;;  %v288_v15 = vld [vmem:[#allocation8 + $0x10] sm:$0xff]  ;;  %v596_v16 = vpack.c.bf16 %v287_v14, %v286_v13  ;;  %v290_v19 = vld [vmem:[#allocation8 + $0x20] sm:$0xff]  ;;  %v291_v20 = vld [vmem:[#allocation8 + $0x28] sm:$0xff] }
  0x5c   :  { %580 = vmatprep.subr.bf16.mxu1 %v753_v0  ;;  %v599_v18 = vpack.c.bf16 %v289_v17, %v288_v15  ;;  %v602_v21 = vpack.c.bf16 %v291_v20, %v290_v19  ;;  %v292_v22 = vld [vmem:[#allocation8 + $0x30] sm:$0xff]  ;;  %v293_v23 = vld [vmem:[#allocation8 + $0x38] sm:$0xff]  ;;  %v294_v25 = vld [vmem:[#allocation8 + $0x40] sm:$0xff] }
  0x5d   :  { %558 = vmatpush3.bf16.msra.mxu0 %v557_v41  ;;  %v605_v24 = vpack.c.bf16 %v293_v23, %v292_v22  ;;  %v295_v26 = vld [vmem:[#allocation8 + $0x48] sm:$0xff]  ;;  %v296_v28 = vld [vmem:[#allocation8 + $0x50] sm:$0xff]  ;;  %v297_v29 = vld [vmem:[#allocation8 + $0x58] sm:$0xff] }
  0x5e   :  { %560 = vmatprep.subr.bf16.mxu0 %v559_v42  ;;  %v608_v27 = vpack.c.bf16 %v295_v26, %v294_v25  ;;  %v611_v30 = vpack.c.bf16 %v297_v29, %v296_v28  ;;  %v298_v31 = vld [vmem:[#allocation8 + $0x60] sm:$0xff]  ;;  %v299_v32 = vld [vmem:[#allocation8 + $0x68] sm:$0xff]  ;;  %v397_v35 = vld [vmem:[%s893_s2] ss:$0 sm:$0xff] }
  0x5f   :  { %582 = vmatpush3.bf16.msra.mxu1 %v581_v56  ;;  %v614_v33 = vpack.c.bf16 %v299_v32, %v298_v31  ;;  %v300_v40 = vld [vmem:[#allocation8 + $0x70] sm:$0xff]  ;;  %v301_v41 = vld [vmem:[#allocation8 + $0x78] sm:$0xff] }
  0x60   :  { %583 = vmatprep.subr.bf16.mxu1 %v753_v0  ;;  %v617_v42 = vpack.c.bf16 %v301_v41, %v300_v40  ;;  %v398_v43 = vld [vmem:[%s895_s4] ss:$0 sm:$0xff] }
  0x61   :  { %562 = vmatpush3.bf16.msra.mxu0 %v561_v50  ;;  %v399_v47 = vld [vmem:[%s897_s6] ss:$0 sm:$0xff] }
  0x62   :  { %564 = vmatprep.subr.bf16.mxu0 %v563_v51 }
  0x63   :  { %585 = vmatpush3.bf16.msra.mxu1 %v584_v63 }
  0x64   :  { %586 = vmatprep.subr.bf16.mxu1 %v753_v0 }
  0x65   :  { %566 = vmatpush3.bf16.msra.mxu0 %v565_v59 }
  0x66   :  { %568 = vmatprep.subr.bf16.mxu0 %v567_v60 }
  0x67   :  { %588 = vmatpush3.bf16.msra.mxu1 %v587_v4 }
  0x68   :  { %589 = vmatprep.subr.bf16.mxu1 %v753_v0 }
  0x69   :  { %570 = vmatpush3.bf16.msra.mxu0 %v569_v3 }
  0x6a   :  { %595 = vmatprep.subr.bf16.mxu0 %v753_v0 }
  0x6b   :  { %591 = vmatpush3.bf16.msra.mxu1 %v590_v8 }
  0x6c   :  { %186 = vmatmul.mubr.f32.vlgmr.msra.gmra.mrb[0].mxu0 %v80_v5  ;;  %592 = vmatprep.subr.bf16.mxu1 %v753_v0 }
  0x6d   :  { %536 = vmatprep.mubr.msk.f32.mxu0 %vm754_vm0, %v755_v12  ;;  %597 = vmatpush3.bf16.msra.mxu0 %v596_v16 }
  0x6e   :  { %598 = vmatprep.subr.bf16.mxu0 %v753_v0 }
  0x6f   :  { %594 = vmatpush3.bf16.msra.mxu1 %v593_v11 }
  0x71   :  { %600 = vmatpush3.bf16.msra.mxu0 %v599_v18 }
  0x72   :  { %601 = vmatprep.subr.bf16.mxu0 %v753_v0 }
  0x75   :  { %603 = vmatpush3.bf16.msra.mxu0 %v602_v21 }
  0x76   :  { %604 = vmatprep.subr.bf16.mxu0 %v753_v0 }
  0x79   :  { %606 = vmatpush3.bf16.msra.mxu0 %v605_v24 }
  0x7a   :  { %607 = vmatprep.subr.bf16.mxu0 %v753_v0 }
  0x7d   :  { %609 = vmatpush3.bf16.msra.mxu0 %v608_v27 }
  0x7e   :  { %610 = vmatprep.subr.bf16.mxu0 %v753_v0 }
  0x81   :  { %612 = vmatpush3.bf16.msra.mxu0 %v611_v30 }
  0x82   :  { %613 = vmatprep.subr.bf16.mxu0 %v753_v0 }
  0x85   :  { %615 = vmatpush3.bf16.msra.mxu0 %v614_v33 }
  0x86   :  { %616 = vmatprep.subr.bf16.mxu0 %v753_v0 }
  0x89   :  { %618 = vmatpush3.bf16.msra.mxu0 %v617_v42 }
 0x13f   :  { %v432_v34 = vpop.f32.mrb[0].mxu0 }
 0x140   :  { %v433_v36 = vpop.f32.mrb[1].mxu0 }
 0x141   :  { %v434_v37 = vadd.f32 %v433_v36, %v432_v34 }
 0x143   :  { %v188_v38 = vadd.f32 %v434_v37, %v397_v35 }
 0x145   :  { %v191_v39 = vmax.f32 %v188_v38, 0.0 }
 0x147   :  { %502 = vmatmul.mubr.f32.vlgmr.msra.gmra.mrb[0].mxu1 %v191_v39 }
 0x21a   :  { %v281_v44 = vpop.f32.mrb[0].mxu1 }
 0x21b   :  { %v282_v0 = vadd.f32 %v398_v43, %v281_v44  ;;  %v503_v45 = vpop.f32.mrb[1].mxu1 }
 0x21d   :  { %v285_v46 = vmax.f32 %v282_v0, 0.0 }
 0x21f   :  { %537 = vmatmul.mubr.f32.vlgmr.msra.gmra.mrb[2].mxu0 %v285_v46 }
 0x2f2   :  { %v375_v48 = vpop.f32.mrb[2].mxu0 }
 0x2f3   :  { %v376_v49 = vadd.f32 %v399_v47, %v375_v48  ;;  %v538_v50 = vpop.f32.mrb[3].mxu0 }
 0x2f5   :  { %379 = vst [vmem:[#allocation10] sm:$0xff] %v376_v49 }
 0x2f6   :  { %728 = shalt.err (!%p725_p8)
}
 0x2f7   :  { %s729_s9 = scalar_lea.hbm %s898_s7, 128 }
 0x2f8   :  { %p730_p9 = scmp.ne.s32.totalorder %s898_s7, %s729_s9  ;;  %p733_p10 = scmp.lt.u32.totalorder %s729_s9, %s898_s7 }
 0x2fa   :  { %p735_p11 = pnand %p733_p10, %p730_p9 }
 0x2fc   :  { %738 = shalt.err (!%p735_p11)
}
 0x2fd   :  { %389 = dma.vmem_to_hbm [thread:$0]  %s387_s29, 128, %s898_s7, [#allocation4]  }
 0x2fe   :  { %745 = dma.done.wait [#allocation4], 128  }
 0x2ff   :  { %746 = vsyncadd [#allocation4], 4294967168 }
 0x300   :  { %393 = vsyncpa [#allocation3], 1 }
 0x301   :  { %394 = vsyncpa [#allocation6], 1 }
 0x302   :  { %395 = vsyncpa [#allocation9], 1 }
 0x303   :  { %396 = vsyncpa [#allocation4], 1 }

</bundles_post_ra>
